<compile_context>
chip_gen: v6e
topology: v6e:2x2x1
jax: 0.10.0
libtpu: 0.0.40
codegen_flags: <defaults>
</compile_context>

<pallas_src>
import math

import jax
import jax.numpy as jnp
from jax.experimental import pallas as pl
from jax.experimental.pallas import tpu as pltpu


def _copy_kernel(x_ref, o_ref):
    # Elementwise pass-through on the current VMEM tile.
    o_ref[...] = x_ref[...]


# ~4 MiB per tile buffer: with in+out each double-buffered that is ~16 MiB of
# VMEM -> fine on every generation once the scoped limit is raised explicitly.
_TARGET_TILE_BYTES = 4 * 1024 * 1024
# Single-full-block fallback is only used when the whole array is small.
_SMALL_FULL_BLOCK_BYTES = 4 * 1024 * 1024
# Explicit scoped-VMEM limit: above v5e's 16 MiB default, below v7x's 64 MiB
# physical VMEM.
_VMEM_LIMIT_BYTES = 48 * 1024 * 1024


def _pick_lane_width(total):
    """Widest lane count (multiple of 128) that divides the element count."""
    for lane in (512, 256, 128):
        if total % lane == 0:
            return lane
    return None


def _pick_tile_rows(rows, lane, itemsize):
    """Largest row-tile that (a) fits ~_TARGET_TILE_BYTES, (b) is a multiple of
    8 sublanes, and (c) divides `rows` evenly when possible (avoids a short,
    masked final grid step)."""
    max_rows = max(8, (_TARGET_TILE_BYTES // (lane * itemsize)) // 8 * 8)
    if rows <= max_rows:
        return rows  # block == full dim -> always legal, single grid step
    t = max_rows
    while t >= 8:
        if rows % t == 0:
            return t
        t -= 8
    return max_rows  # ragged last block; Pallas masks it correctly


def _tiled_copy(x2d, rows, lane, tile_r):
    return pl.pallas_call(
        _copy_kernel,
        out_shape=jax.ShapeDtypeStruct((rows, lane), x2d.dtype),
        grid=(pl.cdiv(rows, tile_r),),
        in_specs=[pl.BlockSpec((tile_r, lane), lambda i: (i, 0))],
        out_specs=pl.BlockSpec((tile_r, lane), lambda i: (i, 0)),
        input_output_aliases={0: 0},
        compiler_params=pltpu.CompilerParams(
            dimension_semantics=("parallel",),
            vmem_limit_bytes=_VMEM_LIMIT_BYTES),
    )(x2d)


def _forward_impl(x):
    """Identity 'forward' for the abstract NeuralNetwork base class."""
    shape = x.shape
    total = math.prod(shape)
    if total == 0:
        return x
    itemsize = jnp.dtype(x.dtype).itemsize
    lane = _pick_lane_width(total)

    if lane is not None:
        # Lane-dense, pipelined copy: unmasked full-width vector stores.
        rows = total // lane
        tile_r = _pick_tile_rows(rows, lane, itemsize)
        x2d = x.reshape(rows, lane)
        return _tiled_copy(x2d, rows, lane, tile_r).reshape(shape)

    # Element count not divisible by 128.
    if total * itemsize <= _SMALL_FULL_BLOCK_BYTES:
        # Small: one full-array block (block_shape == array dims is always
        # legal) — no padding copy needed.
        x2d = x.reshape(1, total)
        out2d = pl.pallas_call(
            _copy_kernel,
            out_shape=jax.ShapeDtypeStruct(x2d.shape, x2d.dtype),
            in_specs=[pl.BlockSpec(x2d.shape, lambda: (0, 0))],
            out_specs=pl.BlockSpec(x2d.shape, lambda: (0, 0)),
            input_output_aliases={0: 0},
        )(x2d)
        return out2d.reshape(shape)

    # Large and odd-sized: pad flat to a multiple of 128, reuse the tiled,
    # pipelined path (never a single giant VMEM block), then slice back.
    pad_lane = 128
    padded = pl.cdiv(total, pad_lane) * pad_lane
    xf = jnp.pad(x.reshape(total), (0, padded - total))
    rows = padded // pad_lane
    tile_r = _pick_tile_rows(rows, pad_lane, itemsize)
    out = _tiled_copy(xf.reshape(rows, pad_lane), rows, pad_lane, tile_r)
    return out.reshape(padded)[:total].reshape(shape)


# donate_argnums=0 makes input_output_aliases={0: 0} a real in-place alias:
# XLA does not insert a defensive copy of x before the custom call.  Shapes are
# static under jit, so all Python-level tiling logic above is trace-time only.
neural_network_forward = jax.jit(_forward_impl, donate_argnums=0)


if __name__ == "__main__":
    key = jax.random.PRNGKey(0)
    # Small NCHW input consistent with a UNet-style module: batch=2, ch=4, 16x16.
    shape, dtype = (2, 4, 16, 16), jnp.float32
    x = jax.random.normal(key, shape, dtype=dtype)

    y = neural_network_forward(x)  # x is donated: do not read it after this call
    jax.block_until_ready(y)

    # Regenerate the reference from the same key (x's buffer was donated).
    x_check = jax.random.normal(key, shape, dtype=dtype)
    assert y.shape == shape and y.dtype == dtype
    assert bool(jnp.array_equal(y, x_check))
    print("KERNEL_OK")
</pallas_src>

<mosaic_0001>
module attributes {stable_mosaic.version = 11 : i64} {
  func.func @_copy_kernel(%arg0: i32, %arg1: memref<4x512xf32, #tpu.memory_space<vmem>>, %arg2: memref<4x512xf32, #tpu.memory_space<vmem>>) attributes {dimension_semantics = [#tpu.dimension_semantics<parallel>], iteration_bounds = array<i64: 1>, scalar_prefetch = 0 : i64, scratch_operands = 0 : i64, tpu.core_type = #tpu.core_type<tc>, window_params = [{transform_indices = @transform_0, window_bounds = array<i64: 4, 512>}, {transform_indices = @transform_1, window_bounds = array<i64: 4, 512>}]} {
    %c0 = arith.constant 0 : index
    %c0_0 = arith.constant 0 : index
    %0 = vector.load %arg1[%c0, %c0_0] : memref<4x512xf32, #tpu.memory_space<vmem>>, vector<4x512xf32>
    %c0_1 = arith.constant 0 : index
    %c0_2 = arith.constant 0 : index
    %1 = vector.load %arg2[%c0_1, %c0_2] : memref<4x512xf32, #tpu.memory_space<vmem>>, vector<4x512xf32>
    tpu.vector_store %arg2[%c0_1, %c0_2], %0 {strides = array<i32>} : memref<4x512xf32, #tpu.memory_space<vmem>>, vector<4x512xf32>,
    return
  }
  func.func @transform_0(%arg0: i32) -> (i32, i32) {
    %c0_i32 = arith.constant 0 : i32
    %c0_i32_0 = arith.constant 0 : i32
    return %arg0, %c0_i32 : i32, i32
  }
  func.func @transform_1(%arg0: i32) -> (i32, i32) {
    %c0_i32 = arith.constant 0 : i32
    %c0_i32_0 = arith.constant 0 : i32
    return %arg0, %c0_i32 : i32, i32
  }
}

</mosaic_0001>

<bundles_post_ra>
// kernel: _forward_impl.1
= control target key start
LH: loop header
LB: loop body
LE: loop exit
PB: predicated region body
PF: predicated region fallthrough
CT: control target
= control target key end

     0   :  { %s38_s0 = inlined_call_operand.vmem [shape: f32[4,512], index: 0, kind: input, shape index: {}, may-alias: {0,1}]   ;;  %s39_s1 = inlined_call_operand.vmem [shape: f32[4,512], index: 1, kind: output, shape index: {}, may-alias: {0,1}]  }
   0x1   :  { %v8_v0 = vld [vmem:[%s38_s0] sm:$0xff]  ;;  %v9_v1 = vld [vmem:[%s38_s0 + $0x8] sm:$0xff] }
   0x2   :  { %10 = vst [vmem:[%s39_s1] sm:$0xff] %v8_v0  ;;  %11 = vst [vmem:[%s39_s1 + $0x8] sm:$0xff] %v9_v1 }

</bundles_post_ra>
